<compile_context>
chip_gen: v5e
topology: v5e:2x2
jax: 0.10.0
libtpu: 0.0.40
codegen_flags: <defaults>
</compile_context>

<pallas_src>
import math
import functools

import jax
import jax.numpy as jnp
from jax.experimental import pallas as pl
from jax.experimental.pallas import tpu as pltpu


# ----------------------------------------------------------------------------
# helpers (usable both inside Pallas kernels and in the JAX reference)
# ----------------------------------------------------------------------------
def _gelu_exact(x):
    # PyTorch F.gelu (exact, erf-based)
    return 0.5 * x * (1.0 + jax.lax.erf(x * (1.0 / math.sqrt(2.0))))


def _layer_norm(x, w, b, eps=1e-5):
    mu = jnp.mean(x, axis=-1, keepdims=True)
    var = jnp.mean(jnp.square(x - mu), axis=-1, keepdims=True)
    return (x - mu) * jax.lax.rsqrt(var + eps) * w + b


def _kmm(x, w):
    """MXU matmul: bf16 inputs, f32 accumulation."""
    return jnp.dot(x.astype(jnp.bfloat16), w.astype(jnp.bfloat16),
                   preferred_element_type=jnp.float32)


def _nbytes(shape, dtype):
    return math.prod(shape) * jnp.dtype(dtype).itemsize


def _vmem_limit(block_bytes):
    # 2x for double-buffering + headroom.  Re-derive per generation for large
    # configs (v5e/v6e: 128 MiB physical VMEM, v7x: 64 MiB physical).
    return int(min(2 * block_bytes + (8 << 20), 100 << 20))


# ----------------------------------------------------------------------------
# Kernel 1: patch embedding  (linear projection + [CLS] token + pos embedding)
# one batch element per grid step
# ----------------------------------------------------------------------------
def _embed_kernel(patches_ref, w_ref, b_ref, cls_ref, pos_ref, out_ref):
    # patches: (1, N, P) bf16   w: (P, E) bf16   b/cls: (1, E) f32   pos: (L, E) f32
    # out:     (1, L, E) f32
    emb = jnp.dot(patches_ref[0], w_ref[...],
                  preferred_element_type=jnp.float32) + b_ref[...]      # (N, E)
    x = jnp.concatenate([cls_ref[...], emb], axis=0)                    # (L, E)
    out_ref[0] = x + pos_ref[...]
    # TODO(synk): embedding_dropout treated as identity (eval mode).


# ----------------------------------------------------------------------------
# Kernel 2: full transformer stack, grid = (batch, layer)
# residual stream carried in VMEM scratch across the layer axis
# ----------------------------------------------------------------------------
def _transformer_kernel(x_ref, wqkv_ref, bqkv_ref, wo_ref, bo_ref,
                        ln1w_ref, ln1b_ref, w1_ref, b1_ref, w2_ref, b2_ref,
                        ln2w_ref, ln2b_ref, out_ref, xs_ref, *, nheads):
    layer = pl.program_id(1)
    n_layers = pl.num_programs(1)
    L, E = xs_ref.shape
    H = nheads
    Dh = E // H
    scale = 1.0 / math.sqrt(Dh)

    @pl.when(layer == 0)
    def _():                                  # load embedded input for this batch elem
        xs_ref[...] = x_ref[0]

    x = xs_ref[...]                           # (L, E) f32 residual stream

    # ---- fused QKV projection: one (L,E) x (E,3E) matmul ----
    qkv = _kmm(x, wqkv_ref[0]) + bqkv_ref[0]                            # (L, 3E) f32

    # head-major (H, L, Dh) via lane slices + stack (no lane-splitting reshape)
    def heads(m):
        return jnp.stack([m[:, h * Dh:(h + 1) * Dh] for h in range(H)],
                         axis=0).astype(jnp.bfloat16)
    qh = heads(qkv[:, 0:E])
    kh = heads(qkv[:, E:2 * E])
    vh = heads(qkv[:, 2 * E:3 * E])

    # ---- attention batched over ALL heads at once ----
    s = jnp.einsum('hld,hmd->hlm', qh, kh,
                   preferred_element_type=jnp.float32) * scale          # (H, L, L)
    s = s - jnp.max(s, axis=-1, keepdims=True)
    p = jnp.exp(s)
    p = p * pl.reciprocal(jnp.sum(p, axis=-1, keepdims=True), approx=True)
    ctx_h = jnp.einsum('hlm,hmd->hld', p.astype(jnp.bfloat16), vh,
                       preferred_element_type=jnp.float32)              # (H, L, Dh)
    ctx = jnp.concatenate([ctx_h[h] for h in range(H)], axis=-1)        # (L, E)

    attn = _kmm(ctx, wo_ref[0]) + bo_ref[0]

    # ---- post-norm residuals (norm_first=False), f32 stats ----
    x1 = _layer_norm(x + attn, ln1w_ref[0], ln1b_ref[0])

    # ---- MLP: Linear(E->F) -> GELU -> Linear(F->E) ----
    hdn = _gelu_exact(_kmm(x1, w1_ref[0]) + b1_ref[0])
    ff = _kmm(hdn, w2_ref[0]) + b2_ref[0]
    x2 = _layer_norm(x1 + ff, ln2w_ref[0], ln2b_ref[0])

    xs_ref[...] = x2                          # carry residual stream to next layer

    @pl.when(layer == n_layers - 1)
    def _():
        out_ref[0] = x2
    # TODO(synk): transformer_dropout treated as identity (eval mode).


# ----------------------------------------------------------------------------
# Wrapper: full Vit forward
# ----------------------------------------------------------------------------
def vit_forward(image, params, *, patch_size, nheads, classifier_type=None):
    B, C, Hi, Wi = image.shape
    p = patch_size
    assert Hi % p == 0 and Wi % p == 0, "image must be divisible by patch size"
    h, w = Hi // p, Wi // p
    N = h * w
    P = C * p * p
    E = params['patch_w'].shape[1]
    assert E % nheads == 0, "vit_dim must be divisible by nheads"
    L = N + 1
    NL = params['wqkv'].shape[0]

    # einops 'b c (h p1) (w p2) -> b (h w) (p1 p2 c)'   (layout glue, plain JAX)
    patches = (image.reshape(B, C, h, p, w, p)
                    .transpose(0, 2, 4, 3, 5, 1)
                    .reshape(B, N, P)).astype(jnp.bfloat16)

    # ---- patch embedding + [CLS] + positional embedding ----
    eblk = (_nbytes((1, N, P), jnp.bfloat16) + _nbytes((P, E), jnp.bfloat16)
            + 2 * _nbytes((1, E), jnp.float32) + _nbytes((L, E), jnp.float32)
            + _nbytes((1, L, E), jnp.float32))
    x = pl.pallas_call(
        _embed_kernel,
        out_shape=jax.ShapeDtypeStruct((B, L, E), jnp.float32),
        grid=(B,),
        in_specs=[
            pl.BlockSpec((1, N, P), lambda b: (b, 0, 0)),
            pl.BlockSpec((P, E), lambda b: (0, 0)),
            pl.BlockSpec((1, E), lambda b: (0, 0)),
            pl.BlockSpec((1, E), lambda b: (0, 0)),
            pl.BlockSpec((L, E), lambda b: (0, 0)),
        ],
        out_specs=pl.BlockSpec((1, L, E), lambda b: (b, 0, 0)),
        compiler_params=pltpu.CompilerParams(
            dimension_semantics=("parallel",),
            vmem_limit_bytes=_vmem_limit(eblk)),
    )(patches, params['patch_w'], params['patch_b'], params['cls'], params['pos'])

    # ---- transformer encoder stack: ONE pallas_call, grid = (batch, layer) ----
    layer_inputs = (x, params['wqkv'], params['bqkv'], params['wo'], params['bo'],
                    params['ln1w'], params['ln1b'], params['w1'], params['b1'],
                    params['w2'], params['b2'], params['ln2w'], params['ln2b'])
    x_idx = lambda b, l: (b, 0, 0)   # activations: per-batch block, resident over layers
    w_idx = lambda b, l: (l, 0, 0)   # weights: per-layer block, pipelined behind compute
    in_specs = [pl.BlockSpec((1, L, E), x_idx)]
    in_specs += [pl.BlockSpec((1,) + a.shape[1:], w_idx) for a in layer_inputs[1:]]

    tblk = _nbytes((1, L, E), jnp.float32)                                # x block
    tblk += sum(_nbytes((1,) + a.shape[1:], a.dtype) for a in layer_inputs[1:])
    tblk += _nbytes((1, L, E), jnp.float32) + _nbytes((L, E), jnp.float32)  # out + scratch

    out = pl.pallas_call(
        functools.partial(_transformer_kernel, nheads=nheads),
        out_shape=jax.ShapeDtypeStruct((B, L, E), jnp.float32),
        grid=(B, NL),
        in_specs=in_specs,
        out_specs=pl.BlockSpec((1, L, E), x_idx),
        scratch_shapes=[pltpu.VMEM((L, E), jnp.float32)],
        compiler_params=pltpu.CompilerParams(
            dimension_semantics=("parallel", "arbitrary"),
            vmem_limit_bytes=_vmem_limit(tblk)),
    )(*layer_inputs)

    x = jnp.transpose(out, (1, 0, 2))    # (L, B, E): PyTorch batch_first=False layout
    if classifier_type == 'token':
        return x[0]
    if classifier_type == 'gap':
        return x.mean(axis=0)
    return x                              # classifier_type=None


# ----------------------------------------------------------------------------
# Pure-JAX reference (same mixed-precision math) for a sanity check
# ----------------------------------------------------------------------------
def _mm(x, w):
    return jnp.einsum('...ik,kj->...ij', x.astype(jnp.bfloat16),
                      w.astype(jnp.bfloat16), preferred_element_type=jnp.float32)


def _reference_forward(image, params, *, patch_size, nheads):
    B, C, Hi, Wi = image.shape
    p = patch_size
    h, w = Hi // p, Wi // p
    patches = (image.reshape(B, C, h, p, w, p)
                    .transpose(0, 2, 4, 3, 5, 1)
                    .reshape(B, h * w, C * p * p))
    E = params['patch_w'].shape[1]
    x = _mm(patches, params['patch_w']) + params['patch_b']             # (B, N, E)
    N = x.shape[1]
    cls = jnp.broadcast_to(params['cls'][None].astype(jnp.float32), (B, 1, E))
    x = jnp.concatenate([cls, x], axis=1) + params['pos'][None]         # (B, L, E)
    L = N + 1
    H = nheads
    Dh = E // H
    for i in range(params['wqkv'].shape[0]):
        qkv = _mm(x, params['wqkv'][i]) + params['bqkv'][i]             # (B, L, 3E)
        q = qkv[..., 0:E].reshape(B, L, H, Dh)
        k = qkv[..., E:2 * E].reshape(B, L, H, Dh)
        v = qkv[..., 2 * E:3 * E].reshape(B, L, H, Dh)
        s = jnp.einsum('blhd,bmhd->bhlm', q.astype(jnp.bfloat16), k.astype(jnp.bfloat16),
                       preferred_element_type=jnp.float32) / math.sqrt(Dh)
        pr = jax.nn.softmax(s, axis=-1)
        ctx = jnp.einsum('bhlm,bmhd->blhd', pr.astype(jnp.bfloat16), v.astype(jnp.bfloat16),
                         preferred_element_type=jnp.float32).reshape(B, L, E)
        attn = _mm(ctx, params['wo'][i]) + params['bo'][i]
        x1 = _layer_norm(x + attn, params['ln1w'][i], params['ln1b'][i])
        ff = _mm(_gelu_exact(_mm(x1, params['w1'][i]) + params['b1'][i]),
                 params['w2'][i]) + params['b2'][i]
        x = _layer_norm(x1 + ff, params['ln2w'][i], params['ln2b'][i])
    return x.transpose(1, 0, 2)                                         # (L, B, E)


# ----------------------------------------------------------------------------
# Deterministic synthetic parameter init (shapes follow Vit.__init__)
# weights bf16 (MXU inputs), biases / LN params / embeddings f32
# ----------------------------------------------------------------------------
def init_params(key, *, channels, image_size, patch_size, vit_dim, nheads,
                mlp_dim, num_layers):
    num_patches = (image_size // patch_size) ** 2
    patch_dim = channels * patch_size ** 2
    E, F, L = vit_dim, mlp_dim, num_patches + 1
    keys = jax.random.split(key, 4 + num_layers)

    def nrm(k, shape, scale=0.02):
        return (scale * jax.random.normal(k, shape)).astype(jnp.float32)

    params = {
        'patch_w': nrm(keys[0], (patch_dim, E)).astype(jnp.bfloat16),   # Linear(patch_dim, E)
        'patch_b': nrm(keys[1], (1, E)),
        'cls': nrm(keys[2], (1, E), scale=1.0),                         # class_token (1,1,E)
        'pos': nrm(keys[3], (L, E), scale=1.0),                         # pos_embedding
    }
    cols = {k: [] for k in ('wqkv', 'bqkv', 'wo', 'bo', 'ln1w', 'ln1b',
                            'w1', 'b1', 'w2', 'b2', 'ln2w', 'ln2b')}
    for i in range(num_layers):
        lk = jax.random.split(keys[4 + i], 12)
        wq, wk, wv = nrm(lk[0], (E, E)), nrm(lk[2], (E, E)), nrm(lk[4], (E, E))
        bq, bk, bv = nrm(lk[1], (1, E)), nrm(lk[3], (1, E)), nrm(lk[5], (1, E))
        cols['wqkv'].append(jnp.concatenate([wq, wk, wv], axis=1))      # fused in_proj
        cols['bqkv'].append(jnp.concatenate([bq, bk, bv], axis=1))
        cols['wo'].append(nrm(lk[6], (E, E)));  cols['bo'].append(nrm(lk[7], (1, E)))
        cols['ln1w'].append(jnp.ones((1, E), jnp.float32))
        cols['ln1b'].append(jnp.zeros((1, E), jnp.float32))
        cols['w1'].append(nrm(lk[8], (E, F)));  cols['b1'].append(nrm(lk[9], (1, F)))
        cols['w2'].append(nrm(lk[10], (F, E))); cols['b2'].append(nrm(lk[11], (1, E)))
        cols['ln2w'].append(jnp.ones((1, E), jnp.float32))
        cols['ln2b'].append(jnp.zeros((1, E), jnp.float32))

    bf16_keys = {'wqkv', 'wo', 'w1', 'w2'}
    for k, v in cols.items():
        dt = jnp.bfloat16 if k in bf16_keys else jnp.float32
        params[k] = jnp.stack(v).astype(dt)
    return params


if __name__ == "__main__":
    # small Vit config: image 16x16, 4 channels, 8x8 patches -> 4 patches, seq=5
    image_size, patch_size, channels = 16, 8, 4
    vit_dim, nheads, mlp_dim, num_layers = 32, 4, 64, 2
    batch = 2

    key = jax.random.PRNGKey(0)
    k_img, k_par = jax.random.split(key)
    image = jax.random.normal(k_img, (batch, channels, image_size, image_size),
                              dtype=jnp.float32)
    params = init_params(k_par, channels=channels, image_size=image_size,
                         patch_size=patch_size, vit_dim=vit_dim, nheads=nheads,
                         mlp_dim=mlp_dim, num_layers=num_layers)

    out = vit_forward(image, params, patch_size=patch_size, nheads=nheads)
    out = jax.block_until_ready(out)

    num_patches = (image_size // patch_size) ** 2
    assert out.shape == (num_patches + 1, batch, vit_dim), out.shape

    ref = _reference_forward(image, params, patch_size=patch_size, nheads=nheads)
    if not jnp.allclose(out, ref, atol=1e-2, rtol=1e-2):
        err = float(jnp.max(jnp.abs(out - ref)))
        raise AssertionError(f"Pallas Vit output mismatch vs JAX reference (max abs err {err})")

    print("KERNEL_OK")
</pallas_src>

<mosaic_0001>
module attributes {stable_mosaic.version = 11 : i64} {
  func.func @_embed_kernel(%arg0: i32, %arg1: memref<1x4x256xbf16, #tpu.memory_space<vmem>>, %arg2: memref<256x32xbf16, #tpu.memory_space<vmem>>, %arg3: memref<1x32xf32, #tpu.memory_space<vmem>>, %arg4: memref<1x32xf32, #tpu.memory_space<vmem>>, %arg5: memref<5x32xf32, #tpu.memory_space<vmem>>, %arg6: memref<1x5x32xf32, #tpu.memory_space<vmem>>) attributes {dimension_semantics = [#tpu.dimension_semantics<parallel>], iteration_bounds = array<i64: 2>, scalar_prefetch = 0 : i64, scratch_operands = 0 : i64, tpu.core_type = #tpu.core_type<tc>, window_params = [{transform_indices = @transform_0, window_bounds = array<i64: 1, 4, 256>}, {pipeline_mode = #tpu.pipeline_mode<synchronous>, transform_indices = @transform_1, window_bounds = array<i64: 256, 32>}, {pipeline_mode = #tpu.pipeline_mode<synchronous>, transform_indices = @transform_2, window_bounds = array<i64: 1, 32>}, {pipeline_mode = #tpu.pipeline_mode<synchronous>, transform_indices = @transform_3, window_bounds = array<i64: 1, 32>}, {pipeline_mode = #tpu.pipeline_mode<synchronous>, transform_indices = @transform_4, window_bounds = array<i64: 5, 32>}, {transform_indices = @transform_5, window_bounds = array<i64: 1, 5, 32>}]} {
    %c0 = arith.constant 0 : index
    %c0_0 = arith.constant 0 : index
    %c0_1 = arith.constant 0 : index
    %0 = vector.load %arg1[%c0, %c0_0, %c0_1] : memref<1x4x256xbf16, #tpu.memory_space<vmem>>, vector<1x4x256xbf16>
    %1 = vector.shape_cast %0 : vector<1x4x256xbf16> to vector<4x256xbf16>
    %c0_2 = arith.constant 0 : index
    %c0_3 = arith.constant 0 : index
    %2 = vector.load %arg2[%c0_2, %c0_3] : memref<256x32xbf16, #tpu.memory_space<vmem>>, vector<256x32xbf16>
    %cst = arith.constant dense<0.000000e+00> : vector<4x32xf32>
    %3 = tpu.matmul %1, %2, %cst {dimension_numbers = #tpu.dot_dimension_numbers<[1], [0], [0], [1], [0, 0, 1, 1], [], []>} : vector<4x256xbf16>, vector<256x32xbf16>, vector<4x32xf32> -> vector<4x32xf32>
    %c0_4 = arith.constant 0 : index
    %c0_5 = arith.constant 0 : index
    %4 = vector.load %arg3[%c0_4, %c0_5] : memref<1x32xf32, #tpu.memory_space<vmem>>, vector<1x32xf32>
    %5 = vector.broadcast %4 : vector<1x32xf32> to vector<4x32xf32>
    %6 = arith.addf %3, %5 : vector<4x32xf32>
    %c0_6 = arith.constant 0 : index
    %c0_7 = arith.constant 0 : index
    %7 = vector.load %arg4[%c0_6, %c0_7] : memref<1x32xf32, #tpu.memory_space<vmem>>, vector<1x32xf32>
    %8 = tpu.concatenate %7, %6 in 0 : vector<1x32xf32>, vector<4x32xf32> -> vector<5x32xf32>
    %c0_8 = arith.constant 0 : index
    %c0_9 = arith.constant 0 : index
    %9 = vector.load %arg5[%c0_8, %c0_9] : memref<5x32xf32, #tpu.memory_space<vmem>>, vector<5x32xf32>
    %10 = arith.addf %8, %9 : vector<5x32xf32>
    %c0_10 = arith.constant 0 : index
    %c0_11 = arith.constant 0 : index
    %c0_12 = arith.constant 0 : index
    %11 = vector.load %arg6[%c0_10, %c0_11, %c0_12] : memref<1x5x32xf32, #tpu.memory_space<vmem>>, vector<1x5x32xf32>
    %12 = vector.shape_cast %11 : vector<1x5x32xf32> to vector<5x32xf32>
    %13 = vector.shape_cast %10 : vector<5x32xf32> to vector<1x5x32xf32>
    tpu.vector_store %arg6[%c0_10, %c0_11, %c0_12], %13 {strides = array<i32>} : memref<1x5x32xf32, #tpu.memory_space<vmem>>, vector<1x5x32xf32>,
    return
  }
  func.func @transform_0(%arg0: i32) -> (i32, i32, i32) {
    %c0_i32 = arith.constant 0 : i32
    %c0_i32_0 = arith.constant 0 : i32
    %c0_i32_1 = arith.constant 0 : i32
    return %arg0, %c0_i32, %c0_i32_0 : i32, i32, i32
  }
  func.func @transform_1(%arg0: i32) -> (i32, i32) {
    %c0_i32 = arith.constant 0 : i32
    %c0_i32_0 = arith.constant 0 : i32
    %c0_i32_1 = arith.constant 0 : i32
    return %c0_i32, %c0_i32_0 : i32, i32
  }
  func.func @transform_2(%arg0: i32) -> (i32, i32) {
    %c0_i32 = arith.constant 0 : i32
    %c0_i32_0 = arith.constant 0 : i32
    %c0_i32_1 = arith.constant 0 : i32
    return %c0_i32, %c0_i32_0 : i32, i32
  }
  func.func @transform_3(%arg0: i32) -> (i32, i32) {
    %c0_i32 = arith.constant 0 : i32
    %c0_i32_0 = arith.constant 0 : i32
    %c0_i32_1 = arith.constant 0 : i32
    return %c0_i32, %c0_i32_0 : i32, i32
  }
  func.func @transform_4(%arg0: i32) -> (i32, i32) {
    %c0_i32 = arith.constant 0 : i32
    %c0_i32_0 = arith.constant 0 : i32
    %c0_i32_1 = arith.constant 0 : i32
    return %c0_i32, %c0_i32_0 : i32, i32
  }
  func.func @transform_5(%arg0: i32) -> (i32, i32, i32) {
    %c0_i32 = arith.constant 0 : i32
    %c0_i32_0 = arith.constant 0 : i32
    %c0_i32_1 = arith.constant 0 : i32
    return %arg0, %c0_i32, %c0_i32_0 : i32, i32, i32
  }
}

</mosaic_0001>

<bundles_post_ra>
// kernel: tpu_custom_call.1
= control target key start
LH: loop header
LB: loop body
LE: loop exit
PB: predicated region body
PF: predicated region fallthrough
CT: control target
= control target key end

     0   :  { %s589_s18 = smov 0   ;;  %s667_s0 = inlined_call_operand.vmem [shape: bf16[2,4,256], index: 0, kind: input, shape index: {}]   ;;  %s668_s1 = inlined_call_operand.vmem [shape: bf16[256,32], index: 1, kind: input, shape index: {}]   ;;  %s669_s2 = inlined_call_operand.vmem [shape: f32[1,32], index: 2, kind: input, shape index: {}]   ;;  %s670_s3 = inlined_call_operand.vmem [shape: f32[1,32], index: 3, kind: input, shape index: {}]   ;;  %s671_s4 = inlined_call_operand.vmem [shape: f32[5,32], index: 4, kind: input, shape index: {}]   ;;  %s672_s5 = inlined_call_operand.vmem [shape: f32[2,5,32], index: 5, kind: output, shape index: {}]  }
   0x1 LB: > { %s451_s19 = sadd.s32 4294967295, %s557_s18   ;;  %p455_p0 = scmp.ge.s32.totalorder %s557_s18, 1  ;;  %s557_s18 = sphi %s589_s18, %s15_s18  }
   0x2   : > { %p187_p1 = scmp.lt.s32.totalorder %s557_s18, 3 }
   0x4   : > { %p188_p2 = pnand %p455_p0, %p187_p1 }
   0x5   : > { %p214_p3 = scmp.lt.s32.totalorder (!%p188_p2), %s451_s19, 1 }
   0x6   : > { %191 = sbr.rel (%p188_p2) target bundleno = 179 (0xb3), region = 40 }
   0xb   : > { %v533_v0 = vld [vmem:[%s668_s1 + $0x38] sm:$0xff]  ;;  %v532_v2 = vld [vmem:[%s668_s1 + $0x30] sm:$0xff]  ;;  %s674_s19 = smov (!%p214_p3, %s451_s19), 1  ;;  %v531_v4 = vld [vmem:[%s668_s1 + $0x28] sm:$0xff]  ;;  %vm392_vm0 = vcmask 1040384   ;;  %vm396_vm1 = vcmask 258048  }
   0xc   : > { %v541_v1 = vld [vmem:[%s668_s1 + $0x78] sm:$0xff]  ;;  %362 = vmatpush.bf16.msra.mxu0 %v533_v0  ;;  %v540_v3 = vld [vmem:[%s668_s1 + $0x70] sm:$0xff]  ;;  %s525_s28 = sshll.u32 %s674_s19, 2  ;;  %v539_v5 = vld [vmem:[%s668_s1 + $0x68] sm:$0xff]  ;;  %s458_s10 = sshll.u32 %s674_s19, 3 }
   0xd   : > { %375 = vmatpush.bf16.msra.mxu1 %v541_v1  ;;  %s218_s6 = scalar_lea.vmem %s667_s0, %s525_s28  ;;  %v530_v7 = vld [vmem:[%s668_s1 + $0x20] sm:$0xff]  ;;  %v529_v9 = vld [vmem:[%s668_s1 + $0x18] sm:$0xff]  ;;  %v528_v11 = vld [vmem:[%s668_s1 + $0x10] sm:$0xff]  ;;  %s222_s17 = scalar_lea.vmem %s672_s5, %s458_s10 }
   0xe   : > { %v223_v6 = vld [vmem:[%s218_s6] sm:$0xf]  ;;  %v537_v10 = vld [vmem:[%s668_s1 + $0x58] sm:$0xff]  ;;  %v536_v12 = vld [vmem:[%s668_s1 + $0x50] sm:$0xff] }
   0xf   : > { %261 = vst [vmem:[#allocation1] ss:$4 sm:$0xff] %v223_v6  ;;  %v538_v8 = vld [vmem:[%s668_s1 + $0x60] sm:$0xff]  ;;  %v527_v13 = vld [vmem:[%s668_s1 + $0x8] sm:$0xff] }
  0x10   : > { %363 = vmatpush.bf16.msra.mxu0 %v532_v2  ;;  %v535_v14 = vld [vmem:[%s668_s1 + $0x48] sm:$0xff]  ;;  %v526_v15 = vld [vmem:[%s668_s1] sm:$0xff] }
  0x11   : > { %376 = vmatpush.bf16.msra.mxu1 %v540_v3  ;;  %v534_v16 = vld [vmem:[%s668_s1 + $0x40] sm:$0xff] }
  0x12   : > { %v550_v19 = vld [vmem:[%s669_s2] ss:$0 sm:$0xff] }
  0x13   : > { %v388_v24 = vld [vmem:[%s670_s3] sm:$0x1] }
  0x14   : > { %364 = vmatpush.bf16.msra.mxu0 %v531_v4  ;;  %v394_v26 = vld [vmem:[%s671_s4] sm:$0x1f] }
  0x15   : > { %377 = vmatpush.bf16.msra.mxu1 %v539_v5 }
  0x16   : > { %v262_v17 = vld.sshfl [vmem:[#allocation1] sm:$0xff pattern:$0x73625140]  ;;  %v263_v18 = vld.sshfl [vmem:[#allocation1 + $0x8] sm:$0xff pattern:$0x73625140] }
  0x18   : > { %365 = vmatpush.bf16.msra.mxu0 %v530_v7 }
  0x19   : > { %378 = vmatpush.bf16.msra.mxu1 %v538_v8 }
  0x1c   : > { %366 = vmatpush.bf16.msra.mxu0 %v529_v9 }
  0x1d   : > { %379 = vmatpush.bf16.msra.mxu1 %v537_v10 }
  0x20   : > { %367 = vmatpush.bf16.msra.mxu0 %v528_v11 }
  0x21   : > { %380 = vmatpush.bf16.msra.mxu1 %v536_v12 }
  0x24   : > { %368 = vmatpush.bf16.msra.mxu0 %v527_v13 }
  0x25   : > { %381 = vmatpush.bf16.msra.mxu1 %v535_v14 }
  0x28   : > { %369 = vmatpush.bf16.msra.mxu0 %v526_v15 }
  0x29   : > { %382 = vmatpush.bf16.msra.mxu1 %v534_v16 }
  0x2b   : > { %370 = vmatmul.bf16.vlgmr.msra.gmra.mxu0 %v262_v17 }
  0x2c   : > { %383 = vmatmul.bf16.vlgmr.msra.gmra.mxu1 %v263_v18 }
  0xa8   : > { %v371_v20 = vpop.f32.mrf.mxu0 }
  0xa9   : > { %v384_v21 = vpop.f32.mrf.mxu1  ;;  %v372_v22 = vadd.f32 %v550_v19, %v371_v20 }
  0xab   : > { %v385_v23 = vadd.f32 %v384_v21, %v372_v22 }
  0xad   : > { %v390_v25 = vrot.slane %v385_v23, 7 }
  0xaf   : > { %v393_v27 = vsel %vm392_vm0, %v388_v24, %v390_v25 }
  0xb0   : > { %v395_v28 = vadd.f32 %v394_v26, %v393_v27  ;;  %v373_v29 = vpop.f32.mrf.mxu0 }
  0xb1   : > { %v386_v30 = vpop.f32.mrf.mxu1 }
  0xb2   : > { %397 = vst.msk [vmem:[%s222_s17] sm:$0x1f] %vm396_vm1, %v395_v28 }
  0xb3 PF: > { %s15_s18 = sadd.s32 1, %s557_s18  }
  0xb4   : > { %p12_p4 = scmp.ge.s32.totalorder %s15_s18, 4  }
  0xb6   :  { %14 = sbr.rel (!%p12_p4) target bundleno = 1 (0x1), region = 70 }

</bundles_post_ra>
